<compile_context>
chip_gen: v7x
topology: tpu7x:2x2x1
jax: 0.10.0
libtpu: 0.0.40
codegen_flags: <defaults>
</compile_context>

<pallas_src>
import jax
import jax.numpy as jnp
import numpy as np
from jax.experimental import pallas as pl
from jax.experimental.pallas import tpu as pltpu


# ---------------------------------------------------------------------------
# Kernel: out[c, n] = x[c, n] * rsqrt(v[c])
# ---------------------------------------------------------------------------
def scale_kernel(x_ref, v_ref, o_ref):
    # x_ref: (Cb, Lb) activations; v_ref: (Cb, 1) float32 stats; o_ref: (Cb, Lb).
    scale = jax.lax.rsqrt(v_ref[...])                      # EUP, f32, Cb elems
    o_ref[...] = (x_ref[...] * scale).astype(o_ref.dtype)  # lane-dense store


# ---------------------------------------------------------------------------
# Block sizing: VMEM byte budget, megacore-friendly, small-input safe.
# ---------------------------------------------------------------------------
def _choose_blocks(C, N, itemsize, *, budget_bytes=3 << 20, target_blocks=8):
    """Pick (c_blk, lane_blk) so one block stays within ~budget_bytes.

    - channel axis is only tiled for large C (256 is a multiple of every
      dtype's sublane requirement; otherwise the full C extent is used);
    - lane axis is sized by the byte budget so the double-buffered working set
      (x + out ~= 4x block) fits every generation's scoped VMEM;
    - if the whole lane axis fits in one block, split into `target_blocks`
      pieces only when each piece still carries >= 1 MiB (v7x megacore gets
      >= 2 blocks without drowning small inputs in per-step overhead).
    """
    c_blk = 256 if (C > 512 and C % 256 == 0) else C

    lane = (budget_bytes // (c_blk * itemsize)) // 128 * 128
    lane = max(lane, 128)
    if lane >= N:
        piece = ((N + target_blocks - 1) // target_blocks + 127) // 128 * 128
        if piece * c_blk * itemsize >= (1 << 20):
            lane = piece          # >= 2 parallel blocks, each >= 1 MiB
        else:
            lane = N              # small input: single full-extent block
    return c_blk, lane


# ---------------------------------------------------------------------------
# Wrapper
# ---------------------------------------------------------------------------
def batchnorm_scale(output1, inv_std1, *, donate_input=False):
    """output1: (C, N) channel-major flat; inv_std1: (C,) strictly positive.

    Returns output1 * rsqrt(inv_std1)[:, None] in output1's dtype.
    (Precondition: inv_std1 > 0; zero/negative gives inf/nan, matching the
    PyTorch forward's 1 / x.pow(0.5) semantics.)
    """
    C, N = output1.shape
    itemsize = jnp.dtype(output1.dtype).itemsize
    c_blk, lane_blk = _choose_blocks(C, N, itemsize)
    block_bytes = c_blk * lane_blk * itemsize

    # Keep the per-channel statistic in float32 regardless of activation dtype.
    v2d = inv_std1.reshape(C, 1).astype(jnp.float32)

    grid = (pl.cdiv(C, c_blk), pl.cdiv(N, lane_blk))

    return pl.pallas_call(
        scale_kernel,
        out_shape=jax.ShapeDtypeStruct((C, N), output1.dtype),
        grid=grid,
        in_specs=[
            pl.BlockSpec((c_blk, lane_blk), lambda i, j: (i, j)),
            pl.BlockSpec((c_blk, 1), lambda i, j: (i, 0)),
        ],
        out_specs=pl.BlockSpec((c_blk, lane_blk), lambda i, j: (i, j)),
        compiler_params=pltpu.CompilerParams(
            dimension_semantics=("parallel", "parallel"),
            # Enough for double-buffered in+out (~4x block) with headroom,
            # capped at 48 MiB so v7x's 64 MiB physical VMEM stays safe.
            vmem_limit_bytes=int(min(48 << 20, max(16 << 20, 6 * block_bytes))),
        ),
        # Reuse output1's HBM buffer when it is dead after this op.
        input_output_aliases=({0: 0} if donate_input else {}),
    )(output1, v2d)


# ---------------------------------------------------------------------------
# Demo / correctness check
# ---------------------------------------------------------------------------
if __name__ == "__main__":
    B, C, H, W = 2, 8, 16, 16

    key = jax.random.PRNGKey(0)
    k_x, _ = jax.random.split(key)

    # output1 is the channel-major flattened activation (C, B*H*W), exactly
    # what the upstream BatchNorm2dInput-style module produces.
    x_nchw = jax.random.normal(k_x, (B, C, H, W), jnp.float32)
    output1 = x_nchw.transpose(1, 0, 2, 3).reshape(C, B * H * W)

    # inv_std1 is a strictly positive per-channel statistic (e.g. var + eps).
    inv_std1 = x_nchw.var(axis=(0, 2, 3)) + 1e-5

    out = jax.block_until_ready(batchnorm_scale(output1, inv_std1))

    # Pure-JAX reference mirroring the PyTorch forward:
    #   inv_std2 = 1 / inv_std1 ** 0.5 ;  out = output1 * inv_std2[:, None]
    ref = output1 * (1.0 / jnp.sqrt(inv_std1))[:, None]

    assert out.shape == ref.shape and out.dtype == ref.dtype, (out.shape, out.dtype)
    np.testing.assert_allclose(np.asarray(out), np.asarray(ref),
                               rtol=1e-4, atol=1e-5)
    print("KERNEL_OK")
</pallas_src>

<mosaic_0001>
module attributes {stable_mosaic.version = 11 : i64} {
  func.func @scale_kernel(%arg0: i32, %arg1: i32, %arg2: memref<8x512xf32, #tpu.memory_space<vmem>>, %arg3: memref<8x1xf32, #tpu.memory_space<vmem>>, %arg4: memref<8x512xf32, #tpu.memory_space<vmem>>) attributes {dimension_semantics = [#tpu.dimension_semantics<parallel>, #tpu.dimension_semantics<parallel>], iteration_bounds = array<i64: 1, 1>, scalar_prefetch = 0 : i64, scratch_operands = 0 : i64, tpu.core_type = #tpu.core_type<tc>, window_params = [{transform_indices = @transform_0, window_bounds = array<i64: 8, 512>}, {transform_indices = @transform_1, window_bounds = array<i64: 8, 1>}, {transform_indices = @transform_2, window_bounds = array<i64: 8, 512>}]} {
    %c0 = arith.constant 0 : index
    %c0_0 = arith.constant 0 : index
    %0 = vector.load %arg3[%c0, %c0_0] : memref<8x1xf32, #tpu.memory_space<vmem>>, vector<8x1xf32>
    %1 = math.rsqrt %0 : vector<8x1xf32>
    %c0_1 = arith.constant 0 : index
    %c0_2 = arith.constant 0 : index
    %2 = vector.load %arg2[%c0_1, %c0_2] : memref<8x512xf32, #tpu.memory_space<vmem>>, vector<8x512xf32>
    %3 = vector.broadcast %1 : vector<8x1xf32> to vector<8x512xf32>
    %4 = arith.mulf %2, %3 : vector<8x512xf32>
    %c0_3 = arith.constant 0 : index
    %c0_4 = arith.constant 0 : index
    %5 = vector.load %arg4[%c0_3, %c0_4] : memref<8x512xf32, #tpu.memory_space<vmem>>, vector<8x512xf32>
    tpu.vector_store %arg4[%c0_3, %c0_4], %4 {strides = array<i32>} : memref<8x512xf32, #tpu.memory_space<vmem>>, vector<8x512xf32>,
    return
  }
  func.func @transform_0(%arg0: i32, %arg1: i32) -> (i32, i32) {
    %c0_i32 = arith.constant 0 : i32
    return %arg0, %arg1 : i32, i32
  }
  func.func @transform_1(%arg0: i32, %arg1: i32) -> (i32, i32) {
    %c0_i32 = arith.constant 0 : i32
    %c0_i32_0 = arith.constant 0 : i32
    return %arg0, %c0_i32 : i32, i32
  }
  func.func @transform_2(%arg0: i32, %arg1: i32) -> (i32, i32) {
    %c0_i32 = arith.constant 0 : i32
    return %arg0, %arg1 : i32, i32
  }
}

</mosaic_0001>

<bundles_post_ra>
// kernel: tpu_custom_call.1
= control target key start
LH: loop header
LB: loop body
LE: loop exit
PB: predicated region body
PF: predicated region fallthrough
CT: control target
= control target key end

     0   :  { %7 = vsyncpa [#allocation3], 0  ;;  %s157_s0 = inlined_call_operand.hbm [shape: f32[8,512], index: 0, kind: input, shape index: {}]   ;;  %s158_s1 = inlined_call_operand.vmem [shape: f32[8,1], index: 1, kind: input, shape index: {}]   ;;  %s159_s2 = inlined_call_operand.hbm [shape: f32[8,512], index: 2, kind: output, shape index: {}]  }
   0x1   :  { %8 = vsyncpa [#allocation4], 0  ;;  %s112_s9 = smov [#allocation2]   ;;  %s64_s13 = scalar_lea.hbm %s157_s0, 512 }
   0x2   :  { %s15_s10 = sshll.u32 %s112_s9, 4  ;;  %p65_p0 = scmp.ne.s32.totalorder %s157_s0, %s64_s13  ;;  %s16_s10 = int_to_ptr.vmem [resolvable:$true] %s15_s10 }
   0x3   :  { %p68_p1 = scmp.lt.u32.totalorder %s64_s13, %s157_s0 }
   0x5   :  { %p70_p2 = pnand %p68_p1, %p65_p0 }
   0x7   :  { %73 = shalt.err (!%p70_p2)
}
   0x8   :  { %s74_s18 = scalar_lea.vmem %s16_s10, 512  ;;  %p79_p4 = scmp.lt.s32.totalorder %s16_s10, %s16_s10 }
   0x9   :  { %p75_p3 = scmp.ne.s32.totalorder %s16_s10, %s74_s18  ;;  %p80_p5 = scmp.lt.s32.totalorder %s74_s18, %s74_s18 }
   0xb   :  { %p81_p6 = por %p80_p5, %p79_p4 }
   0xd   :  { %p82_p7 = pnand %p81_p6, %p75_p3 }
   0xf   :  { %85 = shalt.err (!%p82_p7)
}
  0x10   :  { %18 = dma.hbm_to_vmem [thread:$0]  %s157_s0, 512, %s16_s10, [#allocation3]  }
  0x11   :  { %108 = dma.done.wait [#allocation3], 512  }
  0x12   :  { %109 = vsyncadd [#allocation3], 4294966784  ;;  %v113_v0 = vmov 0   ;;  %v24_v1 = vld [vmem:[%s158_s1] sm:$0xff]  ;;  %v27_v4 = vld [vmem:[#allocation2 + $0x8] sm:$0xff]  ;;  %s114_s23 = smov [#allocation5]  }
  0x13   :  { %61 = vset.pattern.permute.xlu0 %v113_v0  ;;  %62 = vrsqrt.f32 %v24_v1  ;;  %v26_v3 = vld [vmem:[#allocation2] sm:$0xff]  ;;  %v28_v5 = vld [vmem:[#allocation2 + $0x10] sm:$0xff]  ;;  %v29_v6 = vld [vmem:[#allocation2 + $0x18] sm:$0xff]  ;;  %s49_s24 = sshll.u32 %s114_s23, 4  ;;  %s50_s24 = int_to_ptr.vmem [resolvable:$true] %s49_s24 }
  0x14   :  { %s86_s0 = scalar_lea.vmem %s50_s24, 512  ;;  %p91_p9 = scmp.lt.s32.totalorder %s50_s24, %s50_s24 }
  0x15   :  { %p87_p8 = scmp.ne.s32.totalorder %s50_s24, %s86_s0  ;;  %p92_p10 = scmp.lt.s32.totalorder %s86_s0, %s86_s0 }
  0x17   :  { %p93_p11 = por %p92_p10, %p91_p9 }
  0x19   :  { %p94_p12 = pnand %p93_p11, %p87_p8 }
  0x1d   :  { %v63_v2 = vpop.eup %62 }
  0x1e   :  { %32 = vperm.xlu0 %61, %v63_v2  }
  0x9d   :  { %v33_v7 = vpop.permute.xlu0 %32 }
  0x9e   :  { %v35_v8 = vmul.f32 %v33_v7, %v26_v3  ;;  %v36_v9 = vmul.f32 %v33_v7, %v27_v4  ;;  %v37_v10 = vmul.f32 %v33_v7, %v28_v5  ;;  %v38_v11 = vmul.f32 %v33_v7, %v29_v6 }
  0xa0   :  { %39 = vst [vmem:[#allocation5] sm:$0xff] %v35_v8  ;;  %40 = vst [vmem:[#allocation5 + $0x8] sm:$0xff] %v36_v9 }
  0xa1   :  { %41 = vst [vmem:[#allocation5 + $0x10] sm:$0xff] %v37_v10  ;;  %42 = vst [vmem:[#allocation5 + $0x18] sm:$0xff] %v38_v11 }
  0xa2   :  { %97 = shalt.err (!%p94_p12)
}
  0xa3   :  { %s98_s26 = scalar_lea.hbm %s159_s2, 512 }
  0xa4   :  { %p99_p13 = scmp.ne.s32.totalorder %s159_s2, %s98_s26  ;;  %p102_p0 = scmp.lt.u32.totalorder %s98_s26, %s159_s2 }
  0xa6   :  { %p104_p1 = pnand %p102_p0, %p99_p13 }
  0xa8   :  { %107 = shalt.err (!%p104_p1)
}
  0xa9   :  { %52 = dma.vmem_to_hbm [thread:$0]  %s50_s24, 512, %s159_s2, [#allocation4]  }
  0xaa   :  { %110 = dma.done.wait [#allocation4], 512  }
  0xab   :  { %111 = vsyncadd [#allocation4], 4294966784 }
  0xac   :  { %56 = vsyncpa [#allocation3], 1 }
  0xad   :  { %57 = vsyncpa [#allocation4], 1 }

</bundles_post_ra>
